<compile_context>
chip_gen: v7x
topology: tpu7x:2x2x1
jax: 0.10.0
libtpu: 0.0.40
codegen_flags: <defaults>
</compile_context>

<pallas_src>
import functools

import jax
import jax.numpy as jnp
from jax.experimental import pallas as pl
from jax.experimental.pallas import tpu as pltpu


_LANE = 128


def _vmem_capacity_bytes():
    """Physical VMEM per TensorCore, with a conservative (v7x-sized) fallback."""
    try:
        info = pltpu.get_tpu_info()
        cap = getattr(info, "vmem_capacity_bytes", None)
        if cap:
            return int(cap)
    except Exception:
        pass
    return 64 * 1024 * 1024


def _focal_loss_kernel(*refs, gamma, has_alpha, reduction, rows_in_last_tile):
    if has_alpha:
        logits_ref, target_ref, alpha_ref, out_ref = refs
    else:
        logits_ref, target_ref, out_ref = refs
        alpha_ref = None

    logits = logits_ref[...].astype(jnp.float32)             # (TN, C)
    tgt = target_ref[...]                                     # (TN, 1) int32
    tn, c = logits.shape

    # --- numerically-stable log-softmax stats (lane-axis reductions only) ---
    m = jnp.max(logits, axis=-1, keepdims=True)               # (TN, 1)
    z = logits - m                                            # (TN, C)
    sumexp = jnp.sum(jnp.exp(z), axis=-1, keepdims=True)      # (TN, 1)

    # --- gather z at target via one-hot mask (no full logp materialization) ---
    col = jax.lax.broadcasted_iota(jnp.int32, (tn, c), 1)
    onehot = col == tgt                                       # (TN, C) bool
    z_t = jnp.sum(jnp.where(onehot, z, 0.0), axis=-1, keepdims=True)
    logpt = z_t - jnp.log(sumexp)                             # (TN, 1)
    pt = jnp.exp(logpt)                                       # (TN, 1)

    if has_alpha:
        alpha = alpha_ref[...].astype(jnp.float32)            # (A, 1) column
        a_rows = alpha.shape[0]
        if a_rows == c:
            # alpha[target] as an MXU matmul (onehot @ alpha): moves the gather
            # off the VALU (co-limiter on v7x and for bf16 inputs on v6e).
            at = jnp.dot(onehot.astype(jnp.float32), alpha,
                         preferred_element_type=jnp.float32)  # (TN, 1)
        elif a_rows == 2:
            # scalar-alpha ([a, 1-a]); valid targets are {0, 1} (same domain
            # torch.gather accepts) -> cheap per-row select.
            at = jnp.where(tgt == 0, alpha[0:1, :], alpha[1:2, :])
        else:
            # general-length alpha: one-hot over len(alpha), MXU gather.
            # NOTE: target >= len(alpha) silently yields at = 0 (torch.gather
            # would raise); documented divergence.
            acol = jax.lax.broadcasted_iota(jnp.int32, (tn, a_rows), 1)
            at = jnp.dot((acol == tgt).astype(jnp.float32), alpha,
                         preferred_element_type=jnp.float32)
        logpt = logpt * at

    # --- focal modulation, specialized on gamma at trace time ---
    if gamma == 0.0:
        loss = -logpt
    else:
        base = jnp.maximum(1.0 - pt, 0.0)   # clamp: pt may round slightly > 1
        if float(gamma).is_integer() and 0.0 < gamma <= 8.0:
            mod = base
            for _ in range(int(gamma) - 1):
                mod = mod * base
        else:
            mod = base ** gamma
        loss = -mod * logpt                                   # (TN, 1)

    if reduction == "none":
        # Rows past N (block padding of the last tile) are sliced off by the
        # wrapper, so no in-kernel row mask is needed on this path.
        out_ref[...] = loss
        return

    def _store_partial(x):
        out_ref[...] = jnp.sum(x, axis=(0, 1), keepdims=True).reshape(1, 1, 1)

    if rows_in_last_tile is None:
        _store_partial(loss)
    else:
        # Only the (partial) last tile pays for the row-validity mask.
        last = pl.num_programs(0) - 1

        @pl.when(pl.program_id(0) == last)
        def _():
            r = jax.lax.broadcasted_iota(jnp.int32, (tn, 1), 0)
            _store_partial(jnp.where(r < rows_in_last_tile, loss, 0.0))

        @pl.when(pl.program_id(0) != last)
        def _():
            _store_partial(loss)


def focal_loss(logits, target, *, gamma=0.0, alpha=None, reduction="mean",
               tile_rows=None):
    """Pallas TPU implementation of FocalLoss.forward.

    logits: (N, C) float array (f32 or bf16)
    target: (N,) integer class indices
    alpha:  None | float | list-of-float  (matches the PyTorch __init__)
    """
    assert logits.ndim == 2, f"logits.ndim: {logits.ndim} != 2"
    assert reduction in {"none", "mean", "sum"}, f"reduction: {reduction}"

    N, C = logits.shape

    # --- alpha setup (glue, matches nn.Module.__init__) ---
    has_alpha = alpha is not None
    if isinstance(alpha, (float, int)) and not isinstance(alpha, bool):
        alpha_vec = jnp.array([float(alpha), 1.0 - float(alpha)], dtype=jnp.float32)
    elif isinstance(alpha, (list, tuple)):
        alpha_vec = jnp.array(alpha, dtype=jnp.float32)
    elif alpha is None:
        alpha_vec = None
    else:
        alpha_vec = jnp.asarray(alpha, dtype=jnp.float32).reshape(-1)

    # --- generation-aware tile sizing: cap by bytes, not rows ---
    itemsize = int(jnp.dtype(logits.dtype).itemsize)
    c_pad = ((C + _LANE - 1) // _LANE) * _LANE
    vmem_cap = _vmem_capacity_bytes()
    # ~8 MiB DMA blocks on 128-MiB-VMEM parts (v5e/v6e), ~5 MiB on 64-MiB (v7x).
    target_tile_bytes = (8 << 20) if vmem_cap >= (96 << 20) else (5 << 20)
    # Per-row VMEM footprint: double-buffered input block at its REAL itemsize
    # plus a generous allowance (~8 copies) for the f32 working arrays the
    # compiler may keep live (upcast, z, exp(z), iota/one-hot, selects), plus
    # the double-buffered target column.
    per_row_dma = max(1, C * itemsize)
    per_row_vmem = 2 * c_pad * itemsize + 8 * c_pad * 4 + 2 * _LANE * 4
    vmem_budget = int(0.65 * vmem_cap)

    n_pad8 = (N + 7) // 8 * 8
    if tile_rows is None:
        tn = min(target_tile_bytes // per_row_dma,
                 max(8, (vmem_budget - (2 << 20)) // per_row_vmem),
                 8192)
        tn = max(8, (int(tn) // 8) * 8)
    else:
        tn = int(max(8, (int(tile_rows) + 7) // 8 * 8))
    tn = min(tn, n_pad8)
    num_tiles = int(pl.cdiv(N, tn))

    rows_in_last = N - (num_tiles - 1) * tn
    rows_in_last_tile = rows_in_last if rows_in_last < tn else None

    target_2d = target.reshape(N, 1).astype(jnp.int32)

    operands = [logits, target_2d]
    in_specs = [pl.BlockSpec((tn, C), lambda i: (i, 0)),
                pl.BlockSpec((tn, 1), lambda i: (i, 0))]
    alpha_bytes = 0
    if has_alpha:
        alpha_col = alpha_vec.reshape(-1, 1)                  # (A, 1) column
        A = alpha_col.shape[0]
        alpha_bytes = A * 4
        operands.append(alpha_col)
        in_specs.append(pl.BlockSpec((A, 1), lambda i: (0, 0)))

    if reduction == "none":
        out_shape = jax.ShapeDtypeStruct((num_tiles * tn, 1), jnp.float32)
        out_spec = pl.BlockSpec((tn, 1), lambda i: (i, 0))
        out_bytes = num_tiles * tn * 4
    else:
        out_shape = jax.ShapeDtypeStruct((num_tiles, 1, 1), jnp.float32)
        out_spec = pl.BlockSpec((1, 1, 1), lambda i: (i, 0, 0))
        out_bytes = num_tiles * 4

    kernel = functools.partial(
        _focal_loss_kernel,
        gamma=float(gamma),
        has_alpha=has_alpha,
        reduction=reduction,
        rows_in_last_tile=rows_in_last_tile,
    )

    cost = pl.CostEstimate(
        flops=int((8 + (2 if has_alpha else 0)) * N * C),
        transcendentals=int(N * C + 3 * N),
        bytes_accessed=int(N * C * itemsize + N * 4 + alpha_bytes + out_bytes),
    )

    # Exact, generation-aware VMEM request (clamped below physical capacity).
    # NOTE: for enormous C this can clamp below the true need; see C-tiling TODO.
    vmem_need = tn * per_row_vmem + (4 << 20)
    vmem_limit = int(min(max(vmem_need, 16 << 20),
                         min(100 << 20, int(0.85 * vmem_cap))))

    out = pl.pallas_call(
        kernel,
        out_shape=out_shape,
        grid=(num_tiles,),
        in_specs=in_specs,
        out_specs=out_spec,
        compiler_params=pltpu.CompilerParams(
            dimension_semantics=("parallel",),
            vmem_limit_bytes=vmem_limit,
        ),
        cost_estimate=cost,
    )(*operands)

    if reduction == "none":
        return out.reshape(-1)[:N]
    total = jnp.sum(out)
    if reduction == "mean":
        return total / N
    return total


def _focal_loss_ref(logits, target, *, gamma, alpha, reduction):
    """Pure-JAX reference mirroring the PyTorch forward."""
    logp = jax.nn.log_softmax(logits.astype(jnp.float32), axis=-1)
    logpt = jnp.take_along_axis(logp, target.reshape(-1, 1), axis=1).reshape(-1)
    pt = jnp.exp(logpt)
    if alpha is not None:
        if isinstance(alpha, (float, int)) and not isinstance(alpha, bool):
            a = jnp.array([float(alpha), 1.0 - float(alpha)], dtype=jnp.float32)
        else:
            a = jnp.asarray(alpha, dtype=jnp.float32)
        logpt = logpt * a[target]
    loss = -1.0 * (1.0 - pt) ** gamma * logpt
    if reduction == "mean":
        return loss.mean()
    if reduction == "sum":
        return loss.sum()
    return loss


if __name__ == "__main__":
    key = jax.random.PRNGKey(0)

    def _check(out, ref, name, rtol=1e-5, atol=1e-5):
        out = jax.block_until_ready(out)
        assert jnp.allclose(out, ref, rtol=rtol, atol=atol), (name, out, ref)

    # 1) multi-tile grid (forced small tile => 3 tiles, partial last tile),
    #    per-class alpha list (MXU gather path), gamma=2, 'mean'
    k1, k2 = jax.random.split(jax.random.fold_in(key, 1))
    N, C = 20, 16
    logits = jax.random.normal(k1, (N, C), dtype=jnp.float32)
    target = jax.random.randint(k2, (N,), 0, C, dtype=jnp.int32)
    alpha = [0.1 + 0.9 * i / (C - 1) for i in range(C)]
    out = focal_loss(logits, target, gamma=2.0, alpha=alpha,
                     reduction="mean", tile_rows=8)
    ref = _focal_loss_ref(logits, target, gamma=2.0, alpha=alpha, reduction="mean")
    _check(out, ref, "mean/alpha-list/multi-tile")

    # 2) odd N and small C (lane padding), no alpha, fractional gamma, 'none'
    k1, k2 = jax.random.split(jax.random.fold_in(key, 2))
    N, C = 10, 5
    logits = jax.random.normal(k1, (N, C), dtype=jnp.float32)
    target = jax.random.randint(k2, (N,), 0, C, dtype=jnp.int32)
    out = focal_loss(logits, target, gamma=1.5, alpha=None, reduction="none")
    ref = _focal_loss_ref(logits, target, gamma=1.5, alpha=None, reduction="none")
    _check(out, ref, "none/no-alpha")

    # 3) scalar alpha ([a, 1-a]) with targets in {0,1}, 'sum'
    k1, k2 = jax.random.split(jax.random.fold_in(key, 3))
    N, C = 24, 4
    logits = jax.random.normal(k1, (N, C), dtype=jnp.float32)
    target = jax.random.randint(k2, (N,), 0, 2, dtype=jnp.int32)
    out = focal_loss(logits, target, gamma=2.0, alpha=0.25, reduction="sum")
    ref = _focal_loss_ref(logits, target, gamma=2.0, alpha=0.25, reduction="sum")
    _check(out, ref, "sum/scalar-alpha")

    # 4) bf16 logits (half the HBM traffic, 2x rows per tile), gamma=0, 'mean'
    k1, k2 = jax.random.split(jax.random.fold_in(key, 4))
    N, C = 16, 32
    logits = jax.random.normal(k1, (N, C), dtype=jnp.float32).astype(jnp.bfloat16)
    target = jax.random.randint(k2, (N,), 0, C, dtype=jnp.int32)
    out = focal_loss(logits, target, gamma=0.0, alpha=None, reduction="mean")
    ref = _focal_loss_ref(logits, target, gamma=0.0, alpha=None, reduction="mean")
    _check(out, ref, "mean/bf16/gamma0", rtol=1e-4, atol=1e-4)

    print("KERNEL_OK")
</pallas_src>

<mosaic_0001>
module attributes {stable_mosaic.version = 11 : i64} {
  func.func @_focal_loss_kernel(%arg0: i32, %arg1: memref<8x16xf32, #tpu.memory_space<vmem>>, %arg2: memref<8x1xi32, #tpu.memory_space<vmem>>, %arg3: memref<16x1xf32, #tpu.memory_space<vmem>>, %arg4: memref<1x1x1xf32, #tpu.memory_space<vmem>>) attributes {dimension_semantics = [#tpu.dimension_semantics<parallel>], iteration_bounds = array<i64: 3>, scalar_prefetch = 0 : i64, scratch_operands = 0 : i64, tpu.core_type = #tpu.core_type<tc>, window_params = [{transform_indices = @transform_0, window_bounds = array<i64: 8, 16>}, {transform_indices = @transform_1, window_bounds = array<i64: 8, 1>}, {pipeline_mode = #tpu.pipeline_mode<synchronous>, transform_indices = @transform_2, window_bounds = array<i64: 16, 1>}, {transform_indices = @transform_3, window_bounds = array<i64: 1, 1, 1>}]} {
    %c0 = arith.constant 0 : index
    %c0_0 = arith.constant 0 : index
    %0 = vector.load %arg1[%c0, %c0_0] : memref<8x16xf32, #tpu.memory_space<vmem>>, vector<8x16xf32>
    %c0_1 = arith.constant 0 : index
    %c0_2 = arith.constant 0 : index
    %1 = vector.load %arg2[%c0_1, %c0_2] : memref<8x1xi32, #tpu.memory_space<vmem>>, vector<8x1xi32>
    %cst = arith.constant dense<0xFF800000> : vector<8xf32>
    %2 = vector.multi_reduction <maximumf>, %0, %cst [1] : vector<8x16xf32> to vector<8xf32>
    %3 = vector.shape_cast %2 : vector<8xf32> to vector<8x1xf32>
    %4 = vector.broadcast %3 : vector<8x1xf32> to vector<8x16xf32>
    %5 = arith.subf %0, %4 : vector<8x16xf32>
    %6 = math.exp %5 : vector<8x16xf32>
    %cst_3 = arith.constant dense<0.000000e+00> : vector<8xf32>
    %7 = vector.multi_reduction <add>, %6, %cst_3 [1] : vector<8x16xf32> to vector<8xf32>
    %8 = vector.shape_cast %7 : vector<8xf32> to vector<8x1xf32>
    %9 = tpu.iota {dimensions = array<i32: 1>} : vector<8x16xi32>
    %10 = vector.broadcast %1 : vector<8x1xi32> to vector<8x16xi32>
    %11 = arith.cmpi eq, %9, %10 : vector<8x16xi32>
    %cst_4 = arith.constant 0.000000e+00 : f32
    %12 = vector.broadcast %cst_4 : f32 to vector<8x16xf32>
    %13 = arith.select %11, %5, %12 : vector<8x16xi1>, vector<8x16xf32>
    %cst_5 = arith.constant dense<0.000000e+00> : vector<8xf32>
    %14 = vector.multi_reduction <add>, %13, %cst_5 [1] : vector<8x16xf32> to vector<8xf32>
    %15 = vector.shape_cast %14 : vector<8xf32> to vector<8x1xf32>
    %16 = math.log %8 : vector<8x1xf32>
    %17 = arith.subf %15, %16 : vector<8x1xf32>
    %18 = math.exp %17 : vector<8x1xf32>
    %c0_6 = arith.constant 0 : index
    %c0_7 = arith.constant 0 : index
    %19 = vector.load %arg3[%c0_6, %c0_7] : memref<16x1xf32, #tpu.memory_space<vmem>>, vector<16x1xf32>
    %20 = arith.extui %11 : vector<8x16xi1> to vector<8x16xi32>
    %21 = arith.sitofp %20 : vector<8x16xi32> to vector<8x16xf32>
    %cst_8 = arith.constant dense<0.000000e+00> : vector<8x1xf32>
    %22 = tpu.matmul %21, %19, %cst_8 {dimension_numbers = #tpu.dot_dimension_numbers<[1], [0], [0], [1], [0, 0, 1, 1], [], []>} : vector<8x16xf32>, vector<16x1xf32>, vector<8x1xf32> -> vector<8x1xf32>
    %23 = arith.mulf %17, %22 : vector<8x1xf32>
    %cst_9 = arith.constant 1.000000e+00 : f32
    %24 = vector.broadcast %cst_9 : f32 to vector<8x1xf32>
    %25 = arith.subf %24, %18 : vector<8x1xf32>
    %cst_10 = arith.constant 0.000000e+00 : f32
    %26 = vector.broadcast %cst_10 : f32 to vector<8x1xf32>
    %27 = arith.maximumf %25, %26 : vector<8x1xf32>
    %28 = arith.mulf %27, %27 : vector<8x1xf32>
    %cst_11 = arith.constant 0.000000e+00 : f32
    %29 = vector.broadcast %cst_11 : f32 to vector<8x1xf32>
    %30 = arith.subf %29, %28 : vector<8x1xf32>
    %31 = arith.mulf %30, %23 : vector<8x1xf32>
    %c2_i32 = arith.constant 2 : i32
    %32 = arith.cmpi eq, %arg0, %c2_i32 : i32
    %33 = arith.extui %32 : i1 to i32
    %c0_i32 = arith.constant 0 : i32
    %34 = arith.cmpi ne, %33, %c0_i32 : i32
    scf.if %34 {
      %38 = tpu.iota {dimensions = array<i32: 0>} : vector<8x1xi32>
      %c4_i32 = arith.constant 4 : i32
      %39 = vector.broadcast %c4_i32 : i32 to vector<8x1xi32>
      %40 = arith.cmpi slt, %38, %39 : vector<8x1xi32>
      %cst_14 = arith.constant 0.000000e+00 : f32
      %41 = vector.broadcast %cst_14 : f32 to vector<8x1xf32>
      %42 = arith.select %40, %31, %41 : vector<8x1xi1>, vector<8x1xf32>
      %43 = vector.shape_cast %42 : vector<8x1xf32> to vector<1x8x1xf32>
      %cst_15 = arith.constant dense<0.000000e+00> : vector<1xf32>
      %44 = vector.multi_reduction <add>, %43, %cst_15 [1, 2] : vector<1x8x1xf32> to vector<1xf32>
      %45 = vector.shape_cast %44 : vector<1xf32> to vector<1x1x1xf32>
      %46 = vector.extract %45[0, 0, 0] : f32 from vector<1x1x1xf32>
      %47 = vector.broadcast %46 : f32 to vector<1x1xf32>
      %48 = vector.shape_cast %47 : vector<1x1xf32> to vector<1x1x1xf32>
      %c0_16 = arith.constant 0 : index
      %c0_17 = arith.constant 0 : index
      %c0_18 = arith.constant 0 : index
      %49 = vector.load %arg4[%c0_16, %c0_17, %c0_18] : memref<1x1x1xf32, #tpu.memory_space<vmem>>, vector<1x1x1xf32>
      tpu.vector_store %arg4[%c0_16, %c0_17, %c0_18], %48 {strides = array<i32>} : memref<1x1x1xf32, #tpu.memory_space<vmem>>, vector<1x1x1xf32>,
    } else {
    }
    %c2_i32_12 = arith.constant 2 : i32
    %35 = arith.cmpi ne, %arg0, %c2_i32_12 : i32
    %36 = arith.extui %35 : i1 to i32
    %c0_i32_13 = arith.constant 0 : i32
    %37 = arith.cmpi ne, %36, %c0_i32_13 : i32
    scf.if %37 {
      %38 = vector.shape_cast %31 : vector<8x1xf32> to vector<1x8x1xf32>
      %cst_14 = arith.constant dense<0.000000e+00> : vector<1xf32>
      %39 = vector.multi_reduction <add>, %38, %cst_14 [1, 2] : vector<1x8x1xf32> to vector<1xf32>
      %40 = vector.shape_cast %39 : vector<1xf32> to vector<1x1x1xf32>
      %41 = vector.extract %40[0, 0, 0] : f32 from vector<1x1x1xf32>
      %42 = vector.broadcast %41 : f32 to vector<1x1xf32>
      %43 = vector.shape_cast %42 : vector<1x1xf32> to vector<1x1x1xf32>
      %c0_15 = arith.constant 0 : index
      %c0_16 = arith.constant 0 : index
      %c0_17 = arith.constant 0 : index
      %44 = vector.load %arg4[%c0_15, %c0_16, %c0_17] : memref<1x1x1xf32, #tpu.memory_space<vmem>>, vector<1x1x1xf32>
      tpu.vector_store %arg4[%c0_15, %c0_16, %c0_17], %43 {strides = array<i32>} : memref<1x1x1xf32, #tpu.memory_space<vmem>>, vector<1x1x1xf32>,
    } else {
    }
    return
  }
  func.func @transform_0(%arg0: i32) -> (i32, i32) {
    %c0_i32 = arith.constant 0 : i32
    %c0_i32_0 = arith.constant 0 : i32
    return %arg0, %c0_i32 : i32, i32
  }
  func.func @transform_1(%arg0: i32) -> (i32, i32) {
    %c0_i32 = arith.constant 0 : i32
    %c0_i32_0 = arith.constant 0 : i32
    return %arg0, %c0_i32 : i32, i32
  }
  func.func @transform_2(%arg0: i32) -> (i32, i32) {
    %c0_i32 = arith.constant 0 : i32
    %c0_i32_0 = arith.constant 0 : i32
    %c0_i32_1 = arith.constant 0 : i32
    return %c0_i32, %c0_i32_0 : i32, i32
  }
  func.func @transform_3(%arg0: i32) -> (i32, i32, i32) {
    %c0_i32 = arith.constant 0 : i32
    %c0_i32_0 = arith.constant 0 : i32
    %c0_i32_1 = arith.constant 0 : i32
    return %arg0, %c0_i32, %c0_i32_0 : i32, i32, i32
  }
}

</mosaic_0001>

<bundles_post_ra>
// kernel: tpu_custom_call.1
= control target key start
LH: loop header
LB: loop body
LE: loop exit
PB: predicated region body
PF: predicated region fallthrough
CT: control target
= control target key end

     0   :  { %s471_s12 = smov 0   ;;  %s511_s0 = inlined_call_operand.vmem [shape: f32[20,16], index: 0, kind: input, shape index: {}]   ;;  %s512_s1 = inlined_call_operand.vmem [shape: s32[20,1], index: 1, kind: input, shape index: {}]   ;;  %s513_s2 = inlined_call_operand.vmem [shape: f32[16,1], index: 2, kind: input, shape index: {}]   ;;  %s514_s3 = inlined_call_operand.vmem [shape: f32[3,1,1], index: 3, kind: output, shape index: {}]  }
   0x1 LB: > { %s477_s13 = sadd.s32 4294967295, %s445_s12   ;;  %p394_p0 = scmp.ge.s32.totalorder %s445_s12, 1  ;;  %s445_s12 = sphi %s471_s12, %s13_s12  }
   0x2   : > { %p145_p1 = scmp.lt.s32.totalorder %s445_s12, 4 }
   0x4   : > { %p146_p2 = pnand %p394_p0, %p145_p1 }
   0x5   : > { %p170_p3 = scmp.lt.s32.totalorder (!%p146_p2), %s477_s13, 2  ;;  %v208_v0 = vld [vmem:[%s513_s2] sm:$0xff] (!%p146_p2)  ;;  %v209_v1 = vld [vmem:[%s513_s2 + $0x8] sm:$0xff] (!%p146_p2)  ;;  %v447_v2 = vmov (!%p146_p2), 0   ;;  %v448_v3 = vmov (!%p146_p2), 0.0|0.0   ;;  %vm449_vm0 = vmmov (!%p146_p2), 0   ;;  %v193_v9 = vlaneseq (!%p146_p2) }
   0x6   : > { %149 = sbr.rel (%p146_p2) target bundleno = 804 (0x324), region = 32  ;;  %432 = vset.pattern.permute.xlu0 (!%p146_p2), %v447_v2  ;;  %413 = vmatprep.subr.bf16.mxu0 (!%p146_p2), %v448_v3  ;;  %v414_v4 = vpack.c.bf16 (!%p146_p2), %v209_v1, %v208_v0  ;;  %v450_v6 = vmov (!%p146_p2), 0.0   ;;  %vm183_vm1 = vcmask (!%p146_p2), 130048   ;;  %p399_p4 = scmp.ne.s32.totalorder (!%p146_p2), %s477_s13, 2 }
   0x7   : > { %410 = vmatprep.mubr.msk.f32.mxu0 (!%p146_p2), %vm449_vm0, %v450_v6  ;;  %v194_v10 = vand.u32 (!%p146_p2), 127, %v193_v9 }
   0x8   : > { %415 = vmatpush3.bf16.msra.mxu0 (!%p146_p2), %v414_v4 }
   0xd   : > { %s171_s18 = scalar_select %p170_p3, %s477_s13, 2 }
   0xe   : > { %v296_v35 = vshrl.u32 (!%p399_p4), %v193_v9, 7  ;;  %vm299_vm3 = vcmask (!%p399_p4), 7168   ;;  %vm311_vm5 = vcmask (!%p399_p4), 0  }
   0xf   : > { %s395_s19 = sshll.u32 %s171_s18, 3  ;;  %s492_s22 = scalar_lea.vmem %s514_s3, %s171_s18 }
  0x10   : > { %s177_s25 = scalar_lea.vmem %s512_s1, %s395_s19  ;;  %s173_s28 = scalar_lea.vmem %s511_s0, %s395_s19  ;;  %vm297_vm4 = vcmp.lt.s32.totalorder (!%p399_p4), %v296_v35, 4 }
  0x11   : > { %v182_v5 = vld [vmem:[%s177_s25] sm:$0xff] }
  0x12   : > { %196 = vperm.xlu0 %432, %v182_v5   ;;  %v181_v7 = vld [vmem:[%s173_s28] sm:$0xff] }
  0x13   : > { %v184_v8 = vsel %vm183_vm1, %v181_v7, -inf }
  0x31   : > { %185 = vmax.xlane.f32.xlu0 %v184_v8 }
  0x91   : > { %v197_v11 = vpop.permute.xlu0 %196 }
  0x92   : > { %vm198_vm2 = vcmp.eq.s32.totalorder %v194_v10, %v197_v11 }
  0x93   : > { %v397_v12 = vsel %vm198_vm2, 1.0, %v450_v6 }
  0x94   : > { %411 = vmatmul.mubr.msk.f32.vlgmr.msra.gmra.mrb[0].mxu0 %vm183_vm1, %v397_v12 }
  0xbe   : > { %v186_v13 = vpop.xlane.xlu0 %185 }
  0xbf   : > { %v187_v14 = vsub.f32 %v181_v7, %v186_v13 }
  0xc1   : > { %v188_v15 = vmul.f32 1.442695, %v187_v14  ;;  %v199_v18 = vsel %vm198_vm2, %v187_v14, 0.0 }
  0xc2   : > { %v200_v19 = vsel %vm183_vm1, %v199_v18, 0.0 }
  0xc3   : > { %433 = vpow2.f32 %v188_v15 }
  0xcd   : > { %v434_v16 = vpop.eup %433 }
  0xce   : > { %v190_v17 = vsel %vm183_vm1, %v434_v16, 0.0 }
  0xcf   : > { %191 = vadd.xlane.f32.xlu1 %v190_v17 }
  0xd3   : > { %201 = vadd.xlane.f32.xlu1 %v200_v19 }
 0x15c   : > { %v192_v20 = vpop.xlane.xlu1 %191 }
 0x15d   : > { %435 = vlog2.f32 %v192_v20 }
 0x160   : > { %v202_v25 = vpop.xlane.xlu1 %201 }
 0x167   : > { %v436_v21 = vpop.eup %435  ;;  %v281_v22 = vpop.f32.mrb[0].mxu0 }
 0x168   : > { %v204_v23 = vmul.f32 0.6931472, %v436_v21  ;;  %v412_v24 = vpop.f32.mrb[1].mxu0 }
 0x16a   : > { %v205_v26 = vsub.f32 %v202_v25, %v204_v23 }
 0x16c   : > { %v206_v27 = vmul.f32 1.442695, %v205_v26  ;;  %v285_v32 = vmul.f32 %v281_v22, %v205_v26 }
 0x16e   : > { %437 = vpow2.f32 %v206_v27 }
 0x178   : > { %v438_v28 = vpop.eup %437 }
 0x179   : > { %v286_v29 = vsub.f32 1.0, %v438_v28 }
 0x17b   : > { %v287_v30 = vmax.f32 %v286_v29, 0.0  ;;  %294 = sbr.rel (%p399_p4) target bundleno = 595 (0x253), region = 36 }
 0x17d   : > { %v288_v31 = vmul.f32 %v287_v30, %v287_v30 }
 0x17f   : > { %v289_v33 = vsub.f32 0.0, %v288_v31 }
 0x181   : > { %v290_v34 = vmul.f32 %v289_v33, %v285_v32 }
 0x183   : > { %v298_v36 = vsel %vm297_vm4, %v290_v34, 0.0 }
 0x184   : > { %v300_v37 = vsel %vm299_vm3, %v298_v36, 0.0 }
 0x185   : > { %301 = vadd.xlane.f32.xlu0 %v300_v37 }
 0x212   : > { %v302_v38 = vpop.xlane.xlu0 %301 }
 0x213   : > { %v303_v39 = vrot.slane %v302_v38, 4 }
 0x215   : > { %v304_v40 = vadd.f32 %v303_v39, %v302_v38 }
 0x217   : > { %v305_v41 = vrot.slane %v304_v40, 2 }
 0x219   : > { %v306_v42 = vadd.f32 %v305_v41, %v304_v40 }
 0x21b   : > { %v307_v43 = vrot.slane %v306_v42, 1 }
 0x21d   : > { %v308_v44 = vadd.f32 %v307_v43, %v306_v42 }
 0x21f   : > { %416 = vpush %v308_v44 }
 0x250   : > { %s417_s29 = spop %416 }
 0x251   : > { %v310_v45 = vstv %s417_s29 }
 0x252   : > { %312 = vst.msk [vmem:[%s492_s22] sm:$0x1] %vm311_vm5, %v310_v45 }
 0x253 PF: > { %p400_p5 = scmp.eq.s32.totalorder %s477_s13, 2 }
 0x254   : > { %vm317_vm6 = vcmask (!%p400_p5), 7168   ;;  %vm329_vm7 = vcmask (!%p400_p5), 0  }
 0x255   : > { %316 = sbr.rel (%p400_p5) target bundleno = 804 (0x324), region = 40  ;;  %v318_v46 = vsel (!%p400_p5), %vm317_vm6, %v290_v34, 0.0 }
 0x256   : > { %319 = vadd.xlane.f32.xlu0 (!%p400_p5), %v318_v46 }
 0x2e3   : > { %v320_v47 = vpop.xlane.xlu0 %319 }
 0x2e4   : > { %v321_v48 = vrot.slane %v320_v47, 4 }
 0x2e6   : > { %v322_v49 = vadd.f32 %v321_v48, %v320_v47 }
 0x2e8   : > { %v323_v50 = vrot.slane %v322_v49, 2 }
 0x2ea   : > { %v324_v51 = vadd.f32 %v323_v50, %v322_v49 }
 0x2ec   : > { %v325_v52 = vrot.slane %v324_v51, 1 }
 0x2ee   : > { %v326_v53 = vadd.f32 %v325_v52, %v324_v51 }
 0x2f0   : > { %418 = vpush %v326_v53 }
 0x321   : > { %s419_s30 = spop %418 }
 0x322   : > { %v328_v54 = vstv %s419_s30 }
 0x323   : > { %330 = vst.msk [vmem:[%s492_s22] sm:$0x1] %vm329_vm7, %v328_v54 }
 0x324 PF: > { %s13_s12 = sadd.s32 1, %s445_s12  }
 0x325   : > { %p10_p6 = scmp.ge.s32.totalorder %s13_s12, 5  }
 0x327   :  { %12 = sbr.rel (!%p10_p6) target bundleno = 1 (0x1), region = 73 }

</bundles_post_ra>
